<compile_context>
chip_gen: v7x
topology: tpu7x:2x2x1
jax: 0.10.0
libtpu: 0.0.40
codegen_flags: <defaults>
</compile_context>

<pallas_src>
import jax
import jax.numpy as jnp
from jax.experimental import pallas as pl
from jax.experimental.pallas import tpu as pltpu


def _round_up(x, m):
    return (x + m - 1) // m * m


def _pick_tile(dim_pad, max_tile):
    """Largest multiple of 128 that divides dim_pad and is <= max_tile."""
    t = min(max_tile, dim_pad)
    while dim_pad % t:
        t -= 128
    return t


def _ar_kernel(x_ref, w_ref, b_ref, o_ref, acc_ref):
    # x_ref: (B_pad, tk)  w_ref: (tk, tn)  b_ref: (1, tn)  o_ref: (B_pad, tn)
    # acc_ref: (B_pad, tn) f32 scratch, resident across the K axis.
    k = pl.program_id(1)

    @pl.when(k == 0)
    def _init():
        # Fold the bias into the accumulator init (broadcast once per output
        # tile, not once per K step).
        acc_ref[...] = jnp.broadcast_to(b_ref[...], acc_ref.shape)

    acc_ref[...] += jnp.dot(
        x_ref[...], w_ref[...], preferred_element_type=jnp.float32
    )

    @pl.when(k == pl.num_programs(1) - 1)
    def _finalize():
        o_ref[...] = acc_ref[...].astype(o_ref.dtype)


def multivariate_ar_forward(x, weight, bias, tau, *, max_tk=512, max_tn=512):
    """x: (B, T, D) f32, weight: (T*D, tau*D), bias: (tau*D,) -> (B, tau, D)."""
    B, T, D = x.shape
    in_dim = T * D
    out_dim = tau * D
    assert weight.shape == (in_dim, out_dim)
    assert bias.shape == (out_dim,)

    # Pad to TPU-friendly shapes: B -> x8 sublanes, feature dims -> x128 lanes.
    B_pad = _round_up(max(B, 1), 8)
    in_pad = _round_up(in_dim, 128)
    out_pad = _round_up(out_dim, 128)
    tk = _pick_tile(in_pad, max_tk)   # K tile (reduction over T*D)
    tn = _pick_tile(out_pad, max_tn)  # N tile (output columns tau*D)
    num_k = in_pad // tk
    num_n = out_pad // tn

    x2d = jnp.pad(x.reshape(B, in_dim), ((0, B_pad - B), (0, in_pad - in_dim)))
    w_p = jnp.pad(weight, ((0, in_pad - in_dim), (0, out_pad - out_dim)))
    b_p = (
        jnp.pad(bias, (0, out_pad - out_dim))
        .reshape(1, out_pad)
        .astype(jnp.float32)
    )

    # Memory-bound regime: frame scheduling around HBM bytes, not FLOPs.
    cost = pl.CostEstimate(
        flops=2 * B_pad * in_pad * out_pad,
        transcendentals=0,
        bytes_accessed=4 * (B_pad * in_pad + in_pad * out_pad + out_pad + B_pad * out_pad),
    )

    out2d = pl.pallas_call(
        _ar_kernel,
        out_shape=jax.ShapeDtypeStruct((B_pad, out_pad), x.dtype),
        grid_spec=pltpu.PrefetchScalarGridSpec(
            num_scalar_prefetch=0,
            grid=(num_n, num_k),  # reduction (K) axis last
            in_specs=[
                pl.BlockSpec((B_pad, tk), lambda j, k: (0, k)),  # x K-slab (tiny)
                pl.BlockSpec((tk, tn), lambda j, k: (k, j)),     # weight tile (dominant)
                pl.BlockSpec((1, tn), lambda j, k: (0, j)),      # bias tile
            ],
            out_specs=pl.BlockSpec((B_pad, tn), lambda j, k: (0, j)),
            scratch_shapes=[pltpu.VMEM((B_pad, tn), jnp.float32)],
        ),
        compiler_params=pltpu.CompilerParams(
            # N "parallel" -> v7x dual-TC sharding; K is the resident-accumulator axis.
            dimension_semantics=("parallel", "arbitrary"),
            vmem_limit_bytes=32 * 1024 * 1024,
        ),
        cost_estimate=cost,
    )(x2d, w_p, b_p)

    return out2d[:B, :out_dim].reshape(B, tau, D)


def init_params(key, T, D, tau):
    kw, kb = jax.random.split(key)
    in_dim, out_dim = T * D, tau * D
    scale = 1.0 / jnp.sqrt(in_dim)
    weight = jax.random.uniform(kw, (in_dim, out_dim), jnp.float32, -scale, scale)
    bias = jax.random.uniform(kb, (out_dim,), jnp.float32, -scale, scale)
    return weight, bias


if __name__ == "__main__":
    # Small shapes consistent with args: seq_len=T=8, hvs_len=D=32, pred_len=tau=4.
    B, T, D, tau = 2, 8, 32, 4

    key = jax.random.PRNGKey(0)
    kx, kp = jax.random.split(key)
    x = jax.random.normal(kx, (B, T, D), dtype=jnp.float32)
    weight, bias = init_params(kp, T, D, tau)

    y = multivariate_ar_forward(x, weight, bias, tau)
    jax.block_until_ready(y)

    # Correctness check against plain-JAX reference (kept fp32; a bf16 weight
    # cast would halve HBM traffic but trades accuracy, so not applied here).
    y_ref = (x.reshape(B, T * D) @ weight + bias).reshape(B, tau, D)
    assert y.shape == (B, tau, D)
    assert jnp.allclose(y, y_ref, atol=1e-5, rtol=1e-5)

    print("KERNEL_OK")
</pallas_src>

<mosaic_0001>
module attributes {stable_mosaic.version = 11 : i64} {
  func.func @_ar_kernel(%arg0: i32, %arg1: i32, %arg2: memref<8x256xf32, #tpu.memory_space<vmem>>, %arg3: memref<256x128xf32, #tpu.memory_space<vmem>>, %arg4: memref<1x128xf32, #tpu.memory_space<vmem>>, %arg5: memref<8x128xf32, #tpu.memory_space<vmem>>, %arg6: memref<8x128xf32, #tpu.memory_space<vmem>>) attributes {dimension_semantics = [#tpu.dimension_semantics<parallel>, #tpu.dimension_semantics<arbitrary>], iteration_bounds = array<i64: 1, 1>, scalar_prefetch = 0 : i64, scratch_operands = 1 : i64, tpu.core_type = #tpu.core_type<tc>, window_params = [{transform_indices = @transform_0, window_bounds = array<i64: 8, 256>}, {transform_indices = @transform_1, window_bounds = array<i64: 256, 128>}, {transform_indices = @transform_2, window_bounds = array<i64: 1, 128>}, {transform_indices = @transform_3, window_bounds = array<i64: 8, 128>}]} {
    %c0_i32 = arith.constant 0 : i32
    %0 = arith.cmpi eq, %arg1, %c0_i32 : i32
    %1 = arith.extui %0 : i1 to i32
    %c0_i32_0 = arith.constant 0 : i32
    %2 = arith.cmpi ne, %1, %c0_i32_0 : i32
    scf.if %2 {
      %c0_10 = arith.constant 0 : index
      %c0_11 = arith.constant 0 : index
      %12 = vector.load %arg4[%c0_10, %c0_11] : memref<1x128xf32, #tpu.memory_space<vmem>>, vector<1x128xf32>
      %13 = vector.shape_cast %12 : vector<1x128xf32> to vector<1x128xf32>
      %14 = vector.broadcast %13 : vector<1x128xf32> to vector<8x128xf32>
      %c0_12 = arith.constant 0 : index
      %c0_13 = arith.constant 0 : index
      %15 = vector.load %arg6[%c0_12, %c0_13] : memref<8x128xf32, #tpu.memory_space<vmem>>, vector<8x128xf32>
      tpu.vector_store %arg6[%c0_12, %c0_13], %14 {strides = array<i32>} : memref<8x128xf32, #tpu.memory_space<vmem>>, vector<8x128xf32>,
    } else {
    }
    %c0 = arith.constant 0 : index
    %c0_1 = arith.constant 0 : index
    %3 = vector.load %arg6[%c0, %c0_1] : memref<8x128xf32, #tpu.memory_space<vmem>>, vector<8x128xf32>
    %c0_2 = arith.constant 0 : index
    %c0_3 = arith.constant 0 : index
    %4 = vector.load %arg2[%c0_2, %c0_3] : memref<8x256xf32, #tpu.memory_space<vmem>>, vector<8x256xf32>
    %c0_4 = arith.constant 0 : index
    %c0_5 = arith.constant 0 : index
    %5 = vector.load %arg3[%c0_4, %c0_5] : memref<256x128xf32, #tpu.memory_space<vmem>>, vector<256x128xf32>
    %cst = arith.constant dense<0.000000e+00> : vector<8x128xf32>
    %6 = tpu.matmul %4, %5, %cst {dimension_numbers = #tpu.dot_dimension_numbers<[1], [0], [0], [1], [0, 0, 1, 1], [], []>} : vector<8x256xf32>, vector<256x128xf32>, vector<8x128xf32> -> vector<8x128xf32>
    %7 = arith.addf %3, %6 : vector<8x128xf32>
    %c0_6 = arith.constant 0 : index
    %c0_7 = arith.constant 0 : index
    %8 = vector.load %arg6[%c0_6, %c0_7] : memref<8x128xf32, #tpu.memory_space<vmem>>, vector<8x128xf32>
    tpu.vector_store %arg6[%c0_6, %c0_7], %7 {strides = array<i32>} : memref<8x128xf32, #tpu.memory_space<vmem>>, vector<8x128xf32>,
    %c0_i32_8 = arith.constant 0 : i32
    %9 = arith.cmpi eq, %arg1, %c0_i32_8 : i32
    %10 = arith.extui %9 : i1 to i32
    %c0_i32_9 = arith.constant 0 : i32
    %11 = arith.cmpi ne, %10, %c0_i32_9 : i32
    scf.if %11 {
      %c0_10 = arith.constant 0 : index
      %c0_11 = arith.constant 0 : index
      %12 = vector.load %arg6[%c0_10, %c0_11] : memref<8x128xf32, #tpu.memory_space<vmem>>, vector<8x128xf32>
      %c0_12 = arith.constant 0 : index
      %c0_13 = arith.constant 0 : index
      %13 = vector.load %arg5[%c0_12, %c0_13] : memref<8x128xf32, #tpu.memory_space<vmem>>, vector<8x128xf32>
      tpu.vector_store %arg5[%c0_12, %c0_13], %12 {strides = array<i32>} : memref<8x128xf32, #tpu.memory_space<vmem>>, vector<8x128xf32>,
    } else {
    }
    return
  }
  func.func @transform_0(%arg0: i32, %arg1: i32) -> (i32, i32) {
    %c0_i32 = arith.constant 0 : i32
    %c0_i32_0 = arith.constant 0 : i32
    return %c0_i32, %arg1 : i32, i32
  }
  func.func @transform_1(%arg0: i32, %arg1: i32) -> (i32, i32) {
    %c0_i32 = arith.constant 0 : i32
    return %arg1, %arg0 : i32, i32
  }
  func.func @transform_2(%arg0: i32, %arg1: i32) -> (i32, i32) {
    %c0_i32 = arith.constant 0 : i32
    %c0_i32_0 = arith.constant 0 : i32
    return %c0_i32, %arg0 : i32, i32
  }
  func.func @transform_3(%arg0: i32, %arg1: i32) -> (i32, i32) {
    %c0_i32 = arith.constant 0 : i32
    %c0_i32_0 = arith.constant 0 : i32
    return %c0_i32, %arg0 : i32, i32
  }
}

</mosaic_0001>

<bundles_post_ra>
// kernel: tpu_custom_call.1
= control target key start
LH: loop header
LB: loop body
LE: loop exit
PB: predicated region body
PF: predicated region fallthrough
CT: control target
= control target key end

     0   :  { %8 = vsyncpa [#allocation4], 0  ;;  %s397_s0 = inlined_call_operand.hbm [shape: f32[8,256], index: 0, kind: input, shape index: {}]   ;;  %s398_s1 = inlined_call_operand.hbm [shape: f32[256,128], index: 1, kind: input, shape index: {}]   ;;  %s399_s2 = inlined_call_operand.vmem [shape: f32[1,128], index: 2, kind: input, shape index: {}]   ;;  %s400_s3 = inlined_call_operand.hbm [shape: f32[8,128], index: 3, kind: output, shape index: {}]  }
   0x1   :  { %9 = vsyncpa [#allocation7], 0 }
   0x2   :  { %10 = vsyncpa [#allocation5], 0  ;;  %s326_s12 = smov [#allocation3]   ;;  %s327_s14 = smov [#allocation6]  }
   0x3   :  { %s17_s13 = sshll.u32 %s326_s12, 4  ;;  %s26_s15 = sshll.u32 %s327_s14, 4  ;;  %s18_s13 = int_to_ptr.vmem [resolvable:$true] %s17_s13  ;;  %s351_s15 = int_to_ptr.vmem [resolvable:$true] %s26_s15 }
   0x4   :  { %s254_s18 = scalar_lea.hbm %s397_s0, 256 }
   0x5   :  { %p255_p0 = scmp.ne.s32.totalorder %s397_s0, %s254_s18  ;;  %p258_p1 = scmp.lt.u32.totalorder %s254_s18, %s397_s0 }
   0x7   :  { %p260_p2 = pnand %p258_p1, %p255_p0 }
   0x9   :  { %263 = shalt.err (!%p260_p2)
}
   0xa   :  { %s264_s23 = scalar_lea.vmem %s18_s13, 256  ;;  %p269_p4 = scmp.lt.s32.totalorder %s18_s13, %s18_s13 }
   0xb   :  { %p265_p3 = scmp.ne.s32.totalorder %s18_s13, %s264_s23  ;;  %p270_p5 = scmp.lt.s32.totalorder %s264_s23, %s264_s23 }
   0xd   :  { %p271_p6 = por %p270_p5, %p269_p4 }
   0xf   :  { %p272_p7 = pnand %p271_p6, %p265_p3 }
  0x11   :  { %275 = shalt.err (!%p272_p7)
}
  0x12   :  { %20 = dma.hbm_to_vmem [thread:$0]  %s397_s0, 256, %s18_s13, [#allocation4]  }
  0x13   :  { %s276_s28 = scalar_lea.hbm %s398_s1, 4096 }
  0x14   :  { %p277_p8 = scmp.ne.s32.totalorder %s398_s1, %s276_s28  ;;  %p280_p9 = scmp.lt.u32.totalorder %s276_s28, %s398_s1 }
  0x16   :  { %p282_p10 = pnand %p280_p9, %p277_p8 }
  0x18   :  { %285 = shalt.err (!%p282_p10)
}
  0x19   :  { %s286_s6 = scalar_lea.vmem %s351_s15, 4096  ;;  %p291_p12 = scmp.lt.s32.totalorder %s351_s15, %s351_s15 }
  0x1a   :  { %p287_p11 = scmp.ne.s32.totalorder %s351_s15, %s286_s6  ;;  %p292_p13 = scmp.lt.s32.totalorder %s286_s6, %s286_s6 }
  0x1c   :  { %p293_p0 = por %p292_p13, %p291_p12 }
  0x1e   :  { %p294_p1 = pnand %p293_p0, %p287_p11 }
  0x20   :  { %297 = shalt.err (!%p294_p1)
}
  0x21   :  { %s328_s0 = smov 128   ;;  %s329_s7 = smov 8  }
  0x22   :  { %32 = dma.hbm_to_vmem [thread:$0]  %s398_s1, 4096, %s351_s15, [#allocation7], %s328_s0, %s328_s0, %s329_s7  }
  0x23   :  { %320 = dma.done.wait [#allocation4], 256  }
  0x24   :  { %321 = vsyncadd [#allocation4], 4294967040 }
  0x25   :  { %322 = dma.done.wait [#allocation7], 4096  }
  0x26   :  { %323 = vsyncadd [#allocation7], 4294963200  ;;  %v72_v0 = vld [vmem:[#allocation6 + $0x80] sm:$0xff]  ;;  %v73_v1 = vld [vmem:[#allocation6 + $0x88] sm:$0xff]  ;;  %s330_s11 = smov [#allocation8]  }
  0x27   :  { %v56_v2 = vld [vmem:[#allocation6] sm:$0xff]  ;;  %v217_v3 = vpack.c.bf16 %v73_v1, %v72_v0  ;;  %v57_v4 = vld [vmem:[#allocation6 + $0x8] sm:$0xff]  ;;  %v74_v5 = vld [vmem:[#allocation6 + $0x90] sm:$0xff]  ;;  %s171_s12 = sshll.u32 %s330_s11, 4  ;;  %s172_s12 = int_to_ptr.vmem [resolvable:$true] %s171_s12 }
  0x28   :  { %v75_v6 = vld [vmem:[#allocation6 + $0x98] sm:$0xff]  ;;  %v219_v7 = vpack.c.bf16 %v57_v4, %v56_v2  ;;  %v58_v9 = vld [vmem:[#allocation6 + $0x10] sm:$0xff]  ;;  %v76_v11 = vld [vmem:[#allocation6 + $0xa0] sm:$0xff]  ;;  %s298_s13 = scalar_lea.vmem %s172_s12, 128  ;;  %p303_p3 = scmp.lt.s32.totalorder %s172_s12, %s172_s12 }
  0x29   :  { %v221_v8 = vpack.c.bf16 %v75_v6, %v74_v5  ;;  %v59_v10 = vld [vmem:[#allocation6 + $0x18] sm:$0xff]  ;;  %218 = vmatprep.subr.bf16.mxu0 %v217_v3  ;;  %v77_v12 = vld [vmem:[#allocation6 + $0xa8] sm:$0xff]  ;;  %v60_v15 = vld [vmem:[#allocation6 + $0x20] sm:$0xff]  ;;  %p299_p2 = scmp.ne.s32.totalorder %s172_s12, %s298_s13  ;;  %p304_p4 = scmp.lt.s32.totalorder %s298_s13, %s298_s13 }
  0x2a   :  { %220 = vmatpush3.bf16.msra.mxu0 %v219_v7  ;;  %v223_v13 = vpack.c.bf16 %v59_v10, %v58_v9  ;;  %v225_v14 = vpack.c.bf16 %v77_v12, %v76_v11  ;;  %v61_v16 = vld [vmem:[#allocation6 + $0x28] sm:$0xff]  ;;  %v78_v17 = vld [vmem:[#allocation6 + $0xb0] sm:$0xff]  ;;  %v79_v18 = vld [vmem:[#allocation6 + $0xb8] sm:$0xff] }
  0x2b   :  { %222 = vmatprep.subr.bf16.mxu0 %v221_v8  ;;  %v227_v19 = vpack.c.bf16 %v61_v16, %v60_v15  ;;  %v229_v20 = vpack.c.bf16 %v79_v18, %v78_v17  ;;  %v62_v21 = vld [vmem:[#allocation6 + $0x30] sm:$0xff]  ;;  %v63_v22 = vld [vmem:[#allocation6 + $0x38] sm:$0xff]  ;;  %v80_v23 = vld [vmem:[#allocation6 + $0xc0] sm:$0xff]  ;;  %p305_p5 = por %p304_p4, %p303_p3 }
  0x2c   :  { %v81_v24 = vld [vmem:[#allocation6 + $0xc8] sm:$0xff]  ;;  %v55_v25 = vld [vmem:[#allocation3 + $0x8] sm:$0xff]  ;;  %v231_v26 = vpack.c.bf16 %v63_v22, %v62_v21  ;;  %v64_v28 = vld [vmem:[#allocation6 + $0x40] sm:$0xff] }
  0x2d   :  { %152 = vmatprep.mubr.f32.mxu0 %v55_v25  ;;  %v233_v27 = vpack.c.bf16 %v81_v24, %v80_v23  ;;  %v65_v29 = vld [vmem:[#allocation6 + $0x48] sm:$0xff]  ;;  %v82_v30 = vld [vmem:[#allocation6 + $0xd0] sm:$0xff]  ;;  %v83_v31 = vld [vmem:[#allocation6 + $0xd8] sm:$0xff]  ;;  %p306_p6 = pnand %p305_p5, %p299_p2 }
  0x2e   :  { %224 = vmatpush3.bf16.msra.mxu0 %v223_v13  ;;  %v235_v32 = vpack.c.bf16 %v65_v29, %v64_v28  ;;  %v237_v33 = vpack.c.bf16 %v83_v31, %v82_v30  ;;  %v66_v34 = vld [vmem:[#allocation6 + $0x50] sm:$0xff]  ;;  %v67_v35 = vld [vmem:[#allocation6 + $0x58] sm:$0xff]  ;;  %v84_v36 = vld [vmem:[#allocation6 + $0xe0] sm:$0xff] }
  0x2f   :  { %226 = vmatprep.subr.bf16.mxu0 %v225_v14  ;;  %v85_v37 = vld [vmem:[#allocation6 + $0xe8] sm:$0xff]  ;;  %v239_v38 = vpack.c.bf16 %v67_v35, %v66_v34  ;;  %v68_v40 = vld [vmem:[#allocation6 + $0x60] sm:$0xff]  ;;  %v86_v42 = vld [vmem:[#allocation6 + $0xf0] sm:$0xff] }
  0x30   :  { %v241_v39 = vpack.c.bf16 %v85_v37, %v84_v36  ;;  %v69_v41 = vld [vmem:[#allocation6 + $0x68] sm:$0xff]  ;;  %v87_v43 = vld [vmem:[#allocation6 + $0xf8] sm:$0xff]  ;;  %v70_v46 = vld [vmem:[#allocation6 + $0x70] sm:$0xff] }
  0x31   :  { %v243_v44 = vpack.c.bf16 %v69_v41, %v68_v40  ;;  %v245_v45 = vpack.c.bf16 %v87_v43, %v86_v42  ;;  %v71_v47 = vld [vmem:[#allocation6 + $0x78] sm:$0xff]  ;;  %v54_v49 = vld [vmem:[#allocation3] sm:$0xff] }
  0x32   :  { %228 = vmatpush3.bf16.msra.mxu0 %v227_v19  ;;  %v247_v48 = vpack.c.bf16 %v71_v47, %v70_v46  ;;  %v181_v51 = vld [vmem:[%s399_s2] ss:$0 sm:$0xff] }
  0x33   :  { %230 = vmatprep.subr.bf16.mxu0 %v229_v20 }
  0x36   :  { %232 = vmatpush3.bf16.msra.mxu0 %v231_v26 }
  0x37   :  { %234 = vmatprep.subr.bf16.mxu0 %v233_v27 }
  0x3a   :  { %236 = vmatpush3.bf16.msra.mxu0 %v235_v32 }
  0x3b   :  { %238 = vmatprep.subr.bf16.mxu0 %v237_v33 }
  0x3e   :  { %240 = vmatpush3.bf16.msra.mxu0 %v239_v38 }
  0x3f   :  { %242 = vmatprep.subr.bf16.mxu0 %v241_v39 }
  0x42   :  { %244 = vmatpush3.bf16.msra.mxu0 %v243_v44 }
  0x43   :  { %246 = vmatprep.subr.bf16.mxu0 %v245_v45 }
  0x46   :  { %248 = vmatpush3.bf16.msra.mxu0 %v247_v48 }
  0x49   :  { %153 = vmatmul.mubr.f32.vlgmr.msra.gmra.mrb[0].mxu0 %v54_v49 }
 0x11c   :  { %v214_v50 = vpop.f32.mrb[0].mxu0 }
 0x11d   :  { %v215_v52 = vpop.f32.mrb[1].mxu0 }
 0x11e   :  { %v216_v53 = vadd.f32 %v215_v52, %v214_v50 }
 0x120   :  { %v158_v54 = vadd.f32 %v216_v53, %v181_v51 }
 0x122   :  { %164 = vst [vmem:[#allocation8] sm:$0xff] %v158_v54 }
 0x123   :  { %309 = shalt.err (!%p306_p6)
}
 0x124   :  { %s310_s16 = scalar_lea.hbm %s400_s3, 128 }
 0x125   :  { %p311_p7 = scmp.ne.s32.totalorder %s400_s3, %s310_s16  ;;  %p314_p8 = scmp.lt.u32.totalorder %s310_s16, %s400_s3 }
 0x127   :  { %p316_p9 = pnand %p314_p8, %p311_p7 }
 0x129   :  { %319 = shalt.err (!%p316_p9)
}
 0x12a   :  { %174 = dma.vmem_to_hbm [thread:$0]  %s172_s12, 128, %s400_s3, [#allocation5]  }
 0x12b   :  { %324 = dma.done.wait [#allocation5], 128  }
 0x12c   :  { %325 = vsyncadd [#allocation5], 4294967168 }
 0x12d   :  { %178 = vsyncpa [#allocation4], 1 }
 0x12e   :  { %179 = vsyncpa [#allocation7], 1 }
 0x12f   :  { %180 = vsyncpa [#allocation5], 1 }

</bundles_post_ra>
